<compile_context>
chip_gen: v5e
topology: v5e:2x2
jax: 0.10.0
libtpu: 0.0.40
codegen_flags: <defaults>
</compile_context>

<pallas_src>
import math

import jax
import jax.numpy as jnp
from jax.experimental import pallas as pl
from jax.experimental.pallas import tpu as pltpu

_LANE = 128


def _rot_kernel(r_ref, v_ref, o_ref):
    """o = R . v, component-major.

    r_ref: (9, Rr, Rl) rows of the per-quaternion 3x3 rotation matrices (f32)
    v_ref: (3, Vr, Vl) vector components
    o_ref: (3, Or, Ol) rotated vector components
    Whichever of the quaternion / batch axes an operand does not carry has extent 1
    there and is broadcast inside the kernel (never materialized in HBM).
    """
    f32 = jnp.float32
    vx = v_ref[0].astype(f32)
    vy = v_ref[1].astype(f32)
    vz = v_ref[2].astype(f32)
    o_ref[0] = (r_ref[0] * vx + r_ref[1] * vy + r_ref[2] * vz).astype(o_ref.dtype)
    o_ref[1] = (r_ref[3] * vx + r_ref[4] * vy + r_ref[5] * vz).astype(o_ref.dtype)
    o_ref[2] = (r_ref[6] * vx + r_ref[7] * vy + r_ref[8] * vz).astype(o_ref.dtype)


def _sub8(rows: int) -> int:
    """VMEM sublane padding of a second-to-last dim."""
    return -(-rows // 8) * 8


def _vmem_capacity_bytes() -> int:
    try:
        return int(pltpu.get_tpu_info().vmem_capacity_bytes)
    except Exception:
        return 64 << 20  # conservative fallback = v7x per-TensorCore VMEM


def _pick_lane_tile(lanes: int, bytes_per_lane: int, reserved_bytes: int,
                    vmem_cap: int) -> int:
    """Lane tile: multiple of 128, sized so the double-buffered pipelined blocks land
    in the multi-MiB range (amortizes the ~0.35us per-grid-step overhead, >85% of
    HBM roofline) while staying well inside this generation's VMEM."""
    if lanes <= _LANE:
        return lanes                                   # full-extent lane block
    budget = max(int(0.45 * vmem_cap) - reserved_bytes, 2 << 20)
    target = min(budget, 16 << 20)
    tb = max(_LANE, (target // max(bytes_per_lane, 1)) // _LANE * _LANE)
    return min(tb, (lanes // _LANE) * _LANE)


def _rotation_matrix_rows(quaternions: jax.Array) -> jax.Array:
    """(N, 4) (w,x,y,z) -> (9, N) rows of R(q/|q|), float32.  Tiny O(N) op, done once."""
    q = jnp.asarray(quaternions, jnp.float32)
    q = q / jnp.linalg.norm(q, axis=-1, keepdims=True)
    w, x, y, z = q[:, 0], q[:, 1], q[:, 2], q[:, 3]
    return jnp.stack([
        1.0 - 2.0 * (y * y + z * z), 2.0 * (x * y - w * z),       2.0 * (x * z + w * y),
        2.0 * (x * y + w * z),       1.0 - 2.0 * (x * x + z * z), 2.0 * (y * z - w * x),
        2.0 * (x * z - w * y),       2.0 * (y * z + w * x),       1.0 - 2.0 * (x * x + y * y),
    ], axis=0)


def quaternion_rotation_forward(vectors: jax.Array, quaternions: jax.Array) -> jax.Array:
    """Pallas-backed equivalent of QuaternionRotation.forward.

    vectors:     (..., 3)  (last batch dim must broadcast against n_quaternions)
    quaternions: (N, 4)    module parameter (w, x, y, z)
    returns:     broadcast(vectors.shape[:-1], (N,)) + (3,)
    """
    vectors = jnp.asarray(vectors)
    quaternions = jnp.asarray(quaternions)
    assert vectors.shape[-1] == 3 and quaternions.shape[-1] == 4
    n = quaternions.shape[0]

    out_dtype = vectors.dtype if jnp.issubdtype(vectors.dtype, jnp.floating) else jnp.float32
    vectors = vectors.astype(out_dtype)
    vsz = jnp.dtype(out_dtype).itemsize

    v_batch = vectors.shape[:-1]
    batch_shape = jnp.broadcast_shapes(v_batch, (n,))
    m = batch_shape[-1]                     # quaternion-axis size of the output
    lead = batch_shape[:-1]
    b = math.prod(lead)                     # flattened leading batch
    nv = v_batch[-1] if len(v_batch) >= 1 else 1   # 1 => broadcast against quats in-kernel

    r9 = _rotation_matrix_rows(quaternions)        # (9, n) f32

    # Pick which axis is lane-dense: normally the flattened leading batch b; when it
    # is smaller than the quaternion/output axis m (e.g. vectors of shape (N, 3) or
    # (3,)), put m on the lanes instead to avoid a near-empty lane axis.
    lane_on_m = m > b
    v3 = vectors.reshape(b, nv, 3)
    if lane_on_m:
        lanes = m
        v_t = jnp.transpose(v3, (2, 0, 1))         # (3, b, nv)
        r_t = r9.reshape(9, 1, n)                  # (9, 1, n)
        v_rows, r_rows, o_rows = b, 1, b
        v_lane, r_lane = nv, n
        out_dims = (3, b, m)
        out_perm = (1, 2, 0)                       # (3, b, m) -> (b, m, 3)
    else:
        lanes = b
        v_t = jnp.transpose(v3, (2, 1, 0))         # (3, nv, b)
        r_t = r9.reshape(9, n, 1)                  # (9, n, 1)
        v_rows, r_rows, o_rows = nv, n, m
        v_lane, r_lane = b, 1
        out_dims = (3, m, b)
        out_perm = (2, 1, 0)                       # (3, m, b) -> (b, m, 3)

    # Byte accounting: lane-tiled arrays contribute per-lane (double-buffered);
    # grid-invariant blocks (lane dim 1 pads to 128, sublanes to 8) are reserved.
    bpl = 2 * 3 * _sub8(o_rows) * vsz                         # output block
    reserved = 0
    if v_lane == 1:
        reserved += 2 * 3 * _sub8(v_rows) * _LANE * vsz
    else:
        bpl += 2 * 3 * _sub8(v_rows) * vsz
    if r_lane == 1:
        reserved += 2 * 9 * _sub8(r_rows) * _LANE * 4
    else:
        bpl += 2 * 9 * _sub8(r_rows) * 4

    vmem_cap = _vmem_capacity_bytes()
    tb = _pick_lane_tile(lanes, bpl, reserved, vmem_cap)

    def lane_spec(rows, lane_size, leading):
        if lane_size == 1:     # grid-invariant block, broadcast along lanes in-kernel
            return pl.BlockSpec((leading, rows, 1), lambda i: (0, 0, 0))
        return pl.BlockSpec((leading, rows, tb), lambda i: (0, 0, i))

    out_t = pl.pallas_call(
        _rot_kernel,
        out_shape=jax.ShapeDtypeStruct(out_dims, out_dtype),
        # cdiv grid: no input pad / no output tail-slice — Pallas clips the partial
        # last block (the op is elementwise, so garbage in OOB lanes is never written).
        grid=(pl.cdiv(lanes, tb),),
        in_specs=[
            lane_spec(r_rows, r_lane, 9),          # rotation-matrix rows
            lane_spec(v_rows, v_lane, 3),          # vector components
        ],
        out_specs=pl.BlockSpec((3, o_rows, tb), lambda i: (0, 0, i)),
        compiler_params=pltpu.CompilerParams(
            # "parallel" lets the 1-D grid shard across v7x's 2 TensorCores; if xprof
            # ever shows an idle TC, switch to pltpu.CORE_PARALLEL (measure first —
            # both TCs share HBM and this kernel is memory-bound).
            dimension_semantics=("parallel",),
            vmem_limit_bytes=int(min(0.9 * vmem_cap, 100 << 20)),
        ),
    )(r_t, v_t)

    out = jnp.transpose(out_t, out_perm)           # (b, m, 3) — interface adapter only
    return out.reshape(batch_shape + (3,))


def _reference(vectors, quaternions):
    # Pure-JAX mirror of the torch.jit.script double-cross formulation.
    q = quaternions / jnp.linalg.norm(quaternions, axis=-1, keepdims=True)
    q_scalar = q[..., 0]
    q_vec = q[..., 1:]
    t = 2.0 * jnp.cross(q_vec, vectors)
    return vectors + q_scalar[..., None] * t + jnp.cross(q_vec, t)


if __name__ == "__main__":
    key = jax.random.PRNGKey(0)
    k_q, k1, k2, k3, k4 = jax.random.split(key, 5)

    N = 8  # n_quaternions
    # Module __init__: identity quaternions; small deterministic perturbation so the
    # rotation math path is exercised (not just the identity).
    quaternions = jnp.zeros((N, 4), jnp.float32).at[:, 0].set(1.0)
    quaternions = quaternions + 0.1 * jax.random.normal(k_q, (N, 4), jnp.float32)

    cases = [
        jax.random.normal(k1, (2, N, 3), jnp.float32),    # already carries the quat axis
        jax.random.normal(k2, (2, 1, 3), jnp.float32),    # broadcast against quats in-kernel
        jax.random.normal(k3, (130, 1, 3), jnp.float32),  # lane-tiled grid with partial tail block
        jax.random.normal(k4, (N, 3), jnp.float32),       # degenerate: quat axis is the only batch axis
    ]
    for v in cases:
        out = jax.block_until_ready(quaternion_rotation_forward(v, quaternions))
        ref = _reference(v, quaternions)
        assert out.shape == ref.shape, (out.shape, ref.shape)
        assert jnp.allclose(out, ref, atol=1e-5, rtol=1e-5), f"mismatch for input {v.shape}"

    print("KERNEL_OK")
</pallas_src>

<mosaic_0001>
module attributes {stable_mosaic.version = 11 : i64} {
  func.func @_rot_kernel(%arg0: i32, %arg1: memref<9x1x8xf32, #tpu.memory_space<vmem>>, %arg2: memref<3x2x8xf32, #tpu.memory_space<vmem>>, %arg3: memref<3x2x8xf32, #tpu.memory_space<vmem>>) attributes {dimension_semantics = [#tpu.dimension_semantics<parallel>], iteration_bounds = array<i64: 1>, scalar_prefetch = 0 : i64, scratch_operands = 0 : i64, tpu.core_type = #tpu.core_type<tc>, window_params = [{transform_indices = @transform_0, window_bounds = array<i64: 9, 1, 8>}, {transform_indices = @transform_1, window_bounds = array<i64: 3, 2, 8>}, {transform_indices = @transform_2, window_bounds = array<i64: 3, 2, 8>}]} {
    %c0 = arith.constant 0 : index
    %c0_0 = arith.constant 0 : index
    %c0_1 = arith.constant 0 : index
    %0 = vector.load %arg2[%c0, %c0_0, %c0_1] : memref<3x2x8xf32, #tpu.memory_space<vmem>>, vector<1x2x8xf32>
    %1 = vector.shape_cast %0 : vector<1x2x8xf32> to vector<2x8xf32>
    %c1 = arith.constant 1 : index
    %c0_2 = arith.constant 0 : index
    %c0_3 = arith.constant 0 : index
    %2 = vector.load %arg2[%c1, %c0_2, %c0_3] : memref<3x2x8xf32, #tpu.memory_space<vmem>>, vector<1x2x8xf32>
    %3 = vector.shape_cast %2 : vector<1x2x8xf32> to vector<2x8xf32>
    %c2 = arith.constant 2 : index
    %c0_4 = arith.constant 0 : index
    %c0_5 = arith.constant 0 : index
    %4 = vector.load %arg2[%c2, %c0_4, %c0_5] : memref<3x2x8xf32, #tpu.memory_space<vmem>>, vector<1x2x8xf32>
    %5 = vector.shape_cast %4 : vector<1x2x8xf32> to vector<2x8xf32>
    %c0_6 = arith.constant 0 : index
    %c0_7 = arith.constant 0 : index
    %c0_8 = arith.constant 0 : index
    %6 = vector.load %arg1[%c0_6, %c0_7, %c0_8] : memref<9x1x8xf32, #tpu.memory_space<vmem>>, vector<1x1x8xf32>
    %7 = vector.shape_cast %6 : vector<1x1x8xf32> to vector<1x8xf32>
    %8 = vector.broadcast %7 : vector<1x8xf32> to vector<2x8xf32>
    %9 = arith.mulf %8, %1 : vector<2x8xf32>
    %c1_9 = arith.constant 1 : index
    %c0_10 = arith.constant 0 : index
    %c0_11 = arith.constant 0 : index
    %10 = vector.load %arg1[%c1_9, %c0_10, %c0_11] : memref<9x1x8xf32, #tpu.memory_space<vmem>>, vector<1x1x8xf32>
    %11 = vector.shape_cast %10 : vector<1x1x8xf32> to vector<1x8xf32>
    %12 = vector.broadcast %11 : vector<1x8xf32> to vector<2x8xf32>
    %13 = arith.mulf %12, %3 : vector<2x8xf32>
    %14 = arith.addf %9, %13 : vector<2x8xf32>
    %c2_12 = arith.constant 2 : index
    %c0_13 = arith.constant 0 : index
    %c0_14 = arith.constant 0 : index
    %15 = vector.load %arg1[%c2_12, %c0_13, %c0_14] : memref<9x1x8xf32, #tpu.memory_space<vmem>>, vector<1x1x8xf32>
    %16 = vector.shape_cast %15 : vector<1x1x8xf32> to vector<1x8xf32>
    %17 = vector.broadcast %16 : vector<1x8xf32> to vector<2x8xf32>
    %18 = arith.mulf %17, %5 : vector<2x8xf32>
    %19 = arith.addf %14, %18 : vector<2x8xf32>
    %c0_15 = arith.constant 0 : index
    %c0_16 = arith.constant 0 : index
    %c0_17 = arith.constant 0 : index
    %20 = vector.load %arg3[%c0_15, %c0_16, %c0_17] : memref<3x2x8xf32, #tpu.memory_space<vmem>>, vector<1x2x8xf32>
    %21 = vector.shape_cast %20 : vector<1x2x8xf32> to vector<2x8xf32>
    %22 = vector.shape_cast %19 : vector<2x8xf32> to vector<1x2x8xf32>
    tpu.vector_store %arg3[%c0_15, %c0_16, %c0_17], %22 {strides = array<i32>} : memref<3x2x8xf32, #tpu.memory_space<vmem>>, vector<1x2x8xf32>,
    %c3 = arith.constant 3 : index
    %c0_18 = arith.constant 0 : index
    %c0_19 = arith.constant 0 : index
    %23 = vector.load %arg1[%c3, %c0_18, %c0_19] : memref<9x1x8xf32, #tpu.memory_space<vmem>>, vector<1x1x8xf32>
    %24 = vector.shape_cast %23 : vector<1x1x8xf32> to vector<1x8xf32>
    %25 = vector.broadcast %24 : vector<1x8xf32> to vector<2x8xf32>
    %26 = arith.mulf %25, %1 : vector<2x8xf32>
    %c4 = arith.constant 4 : index
    %c0_20 = arith.constant 0 : index
    %c0_21 = arith.constant 0 : index
    %27 = vector.load %arg1[%c4, %c0_20, %c0_21] : memref<9x1x8xf32, #tpu.memory_space<vmem>>, vector<1x1x8xf32>
    %28 = vector.shape_cast %27 : vector<1x1x8xf32> to vector<1x8xf32>
    %29 = vector.broadcast %28 : vector<1x8xf32> to vector<2x8xf32>
    %30 = arith.mulf %29, %3 : vector<2x8xf32>
    %31 = arith.addf %26, %30 : vector<2x8xf32>
    %c5 = arith.constant 5 : index
    %c0_22 = arith.constant 0 : index
    %c0_23 = arith.constant 0 : index
    %32 = vector.load %arg1[%c5, %c0_22, %c0_23] : memref<9x1x8xf32, #tpu.memory_space<vmem>>, vector<1x1x8xf32>
    %33 = vector.shape_cast %32 : vector<1x1x8xf32> to vector<1x8xf32>
    %34 = vector.broadcast %33 : vector<1x8xf32> to vector<2x8xf32>
    %35 = arith.mulf %34, %5 : vector<2x8xf32>
    %36 = arith.addf %31, %35 : vector<2x8xf32>
    %c1_24 = arith.constant 1 : index
    %c0_25 = arith.constant 0 : index
    %c0_26 = arith.constant 0 : index
    %37 = vector.load %arg3[%c1_24, %c0_25, %c0_26] : memref<3x2x8xf32, #tpu.memory_space<vmem>>, vector<1x2x8xf32>
    %38 = vector.shape_cast %37 : vector<1x2x8xf32> to vector<2x8xf32>
    %39 = vector.shape_cast %36 : vector<2x8xf32> to vector<1x2x8xf32>
    tpu.vector_store %arg3[%c1_24, %c0_25, %c0_26], %39 {strides = array<i32>} : memref<3x2x8xf32, #tpu.memory_space<vmem>>, vector<1x2x8xf32>,
    %c6 = arith.constant 6 : index
    %c0_27 = arith.constant 0 : index
    %c0_28 = arith.constant 0 : index
    %40 = vector.load %arg1[%c6, %c0_27, %c0_28] : memref<9x1x8xf32, #tpu.memory_space<vmem>>, vector<1x1x8xf32>
    %41 = vector.shape_cast %40 : vector<1x1x8xf32> to vector<1x8xf32>
    %42 = vector.broadcast %41 : vector<1x8xf32> to vector<2x8xf32>
    %43 = arith.mulf %42, %1 : vector<2x8xf32>
    %c7 = arith.constant 7 : index
    %c0_29 = arith.constant 0 : index
    %c0_30 = arith.constant 0 : index
    %44 = vector.load %arg1[%c7, %c0_29, %c0_30] : memref<9x1x8xf32, #tpu.memory_space<vmem>>, vector<1x1x8xf32>
    %45 = vector.shape_cast %44 : vector<1x1x8xf32> to vector<1x8xf32>
    %46 = vector.broadcast %45 : vector<1x8xf32> to vector<2x8xf32>
    %47 = arith.mulf %46, %3 : vector<2x8xf32>
    %48 = arith.addf %43, %47 : vector<2x8xf32>
    %c8 = arith.constant 8 : index
    %c0_31 = arith.constant 0 : index
    %c0_32 = arith.constant 0 : index
    %49 = vector.load %arg1[%c8, %c0_31, %c0_32] : memref<9x1x8xf32, #tpu.memory_space<vmem>>, vector<1x1x8xf32>
    %50 = vector.shape_cast %49 : vector<1x1x8xf32> to vector<1x8xf32>
    %51 = vector.broadcast %50 : vector<1x8xf32> to vector<2x8xf32>
    %52 = arith.mulf %51, %5 : vector<2x8xf32>
    %53 = arith.addf %48, %52 : vector<2x8xf32>
    %c2_33 = arith.constant 2 : index
    %c0_34 = arith.constant 0 : index
    %c0_35 = arith.constant 0 : index
    %54 = vector.load %arg3[%c2_33, %c0_34, %c0_35] : memref<3x2x8xf32, #tpu.memory_space<vmem>>, vector<1x2x8xf32>
    %55 = vector.shape_cast %54 : vector<1x2x8xf32> to vector<2x8xf32>
    %56 = vector.shape_cast %53 : vector<2x8xf32> to vector<1x2x8xf32>
    tpu.vector_store %arg3[%c2_33, %c0_34, %c0_35], %56 {strides = array<i32>} : memref<3x2x8xf32, #tpu.memory_space<vmem>>, vector<1x2x8xf32>,
    return
  }
  func.func @transform_0(%arg0: i32) -> (i32, i32, i32) {
    %c0_i32 = arith.constant 0 : i32
    %c0_i32_0 = arith.constant 0 : i32
    %c0_i32_1 = arith.constant 0 : i32
    return %c0_i32, %c0_i32_0, %arg0 : i32, i32, i32
  }
  func.func @transform_1(%arg0: i32) -> (i32, i32, i32) {
    %c0_i32 = arith.constant 0 : i32
    %c0_i32_0 = arith.constant 0 : i32
    %c0_i32_1 = arith.constant 0 : i32
    return %c0_i32, %c0_i32_0, %arg0 : i32, i32, i32
  }
  func.func @transform_2(%arg0: i32) -> (i32, i32, i32) {
    %c0_i32 = arith.constant 0 : i32
    %c0_i32_0 = arith.constant 0 : i32
    %c0_i32_1 = arith.constant 0 : i32
    return %c0_i32, %c0_i32_0, %arg0 : i32, i32, i32
  }
}

</mosaic_0001>

<bundles_post_ra>
// kernel: tpu_custom_call.1
= control target key start
LH: loop header
LB: loop body
LE: loop exit
PB: predicated region body
PF: predicated region fallthrough
CT: control target
= control target key end

     0   :  { %vm36_vm0 = vcmask 58368   ;;  %s208_s0 = inlined_call_operand.vmem [shape: f32[9,1,8], index: 0, kind: input, shape index: {}]   ;;  %s209_s1 = inlined_call_operand.vmem [shape: f32[3,2,8], index: 1, kind: input, shape index: {}]   ;;  %s210_s2 = inlined_call_operand.hbm [shape: f32[3,2,8], index: 2, kind: output, shape index: {}]  }
   0x1   :  { %v12_v0 = vld [vmem:[%s209_s1] sm:$0x3]  ;;  %v100_v1 = vld [vmem:[%s209_s1 + $0x2] sm:$0x3]  ;;  %v101_v2 = vld [vmem:[%s209_s1 + $0x4] sm:$0x3] }
   0x2   :  { %v113_v3 = vld [vmem:[%s208_s0] ss:$0 sm:$0xff]  ;;  %v114_v4 = vld [vmem:[%s208_s0 + $0x1] ss:$0 sm:$0xff]  ;;  %v115_v5 = vld [vmem:[%s208_s0 + $0x2] ss:$0 sm:$0xff] }
   0x3   :  { %v21_v6 = vmul.f32 %v113_v3, %v12_v0  ;;  %v116_v7 = vld [vmem:[%s208_s0 + $0x3] ss:$0 sm:$0xff]  ;;  %v27_v8 = vmul.f32 %v114_v4, %v100_v1  ;;  %v34_v9 = vmul.f32 %v115_v5, %v101_v2  ;;  %v117_v10 = vld [vmem:[%s208_s0 + $0x4] ss:$0 sm:$0xff]  ;;  %v118_v12 = vld [vmem:[%s208_s0 + $0x5] ss:$0 sm:$0xff] }
   0x4   :  { %v43_v11 = vmul.f32 %v116_v7, %v12_v0  ;;  %v119_v13 = vld [vmem:[%s208_s0 + $0x6] ss:$0 sm:$0xff]  ;;  %v49_v15 = vmul.f32 %v117_v10, %v100_v1  ;;  %v120_v16 = vld [vmem:[%s208_s0 + $0x7] ss:$0 sm:$0xff]  ;;  %v56_v17 = vmul.f32 %v118_v12, %v101_v2  ;;  %v121_v19 = vld [vmem:[%s208_s0 + $0x8] ss:$0 sm:$0xff] }
   0x5   :  { %v28_v14 = vadd.f32 %v27_v8, %v21_v6  ;;  %v65_v18 = vmul.f32 %v119_v13, %v12_v0 }
   0x6   :  { %7 = vsyncpa [#allocation3], 0  ;;  %v50_v21 = vadd.f32 %v49_v15, %v43_v11  ;;  %v71_v22 = vmul.f32 %v120_v16, %v100_v1  ;;  %s148_s4 = smov [#allocation2]   ;;  %s88_s8 = sshll.u32 %s210_s2, 4  ;;  %v78_v23 = vmul.f32 %v121_v19, %v101_v2  ;;  %s89_s8 = int_to_ptr.hbm [resolvable:$true] %s88_s8 }
   0x7   :  { %v35_v20 = vadd.f32 %v34_v9, %v28_v14  ;;  %s86_s5 = sshll.u32 %s148_s4, 4  ;;  %s149_s0 = smov 32   ;;  %s87_s5 = int_to_ptr.vmem [resolvable:$true] %s86_s5 }
   0x8   :  { %v57_v24 = vadd.f32 %v56_v17, %v50_v21  ;;  %v72_v25 = vadd.f32 %v71_v22, %v65_v18  ;;  %s150_s9 = smov 2  }
   0x9   :  { %37 = vst.msk [vmem:[#allocation2] sm:$0x3] %vm36_vm0, %v35_v20 }
   0xa   :  { %59 = vst.msk [vmem:[#allocation2 + $0x2] sm:$0x3] %vm36_vm0, %v57_v24  ;;  %v79_v26 = vadd.f32 %v78_v23, %v72_v25 }
   0xc   :  { %81 = vst.msk [vmem:[#allocation2 + $0x4] sm:$0x3] %vm36_vm0, %v79_v26 }
   0xd   :  { %94 = dma.vmem_to_hbm [thread:$0]  %s87_s5, 96, %s89_s8, [#allocation3], %s149_s0, %s149_s0, %s150_s9  }
   0xe   :  { %146 = dma.done.wait [#allocation3], 96  }
   0xf   :  { %147 = vsyncadd [#allocation3], 4294967200 }
  0x10   :  { %99 = vsyncpa [#allocation3], 1 }

</bundles_post_ra>
